<compile_context>
chip_gen: v7x
topology: tpu7x:2x2x1
jax: 0.10.0
libtpu: 0.0.40
codegen_flags: <defaults>
</compile_context>

<pallas_src>
import jax
import jax.numpy as jnp
from jax import lax
from jax.experimental import pallas as pl
from jax.experimental.pallas import tpu as pltpu


# ---------------------------------------------------------------------------- kernels

def _phase_shift_roll_kernel(k_ref, x_ref, o_ref):
    # k_ref : SMEM (1,) int32 (scalar-prefetched), shift normalized to [0, T)
    # x_ref : VMEM (T, tile_d) input block, o_ref: (T, tile_d) float32 output block
    k = k_ref[0]
    # Cast first (keeps the dynamic sublane rotate on plain 32-bit rows even for
    # bf16/int8 inputs), then a single XLU cross-sublane rotate for the whole tile.
    o_ref[...] = pltpu.roll(x_ref[...].astype(jnp.float32), k, axis=0)


def _phase_shift_onehot_kernel(k_ref, x_ref, o_ref):
    # Fallback for T not a multiple of 8: build the (T, T) one-hot permutation from
    # iota + the prefetched shift and apply it on the MXU (tiny T -> trivial cost).
    # out[i] = x[(i - k) mod T]  <=>  P[i, j] = 1 iff (j - i + k) in {0, T}.
    T = x_ref.shape[0]
    k = k_ref[0]
    i = lax.broadcasted_iota(jnp.int32, (T, T), 0)
    j = lax.broadcasted_iota(jnp.int32, (T, T), 1)
    d = j - i + k
    p = jnp.logical_or(d == 0, d == T).astype(jnp.float32)
    o_ref[...] = jnp.dot(p, x_ref[...].astype(jnp.float32),
                         preferred_element_type=jnp.float32)


# ---------------------------------------------------------------------------- tiling

def _num_tensorcores() -> int:
    """2 on v7x (megacore-style 2 TCs/chip), else 1. Conservative fallback = 1."""
    try:
        kind = jax.devices()[0].device_kind.lower()
    except Exception:
        return 1
    return 2 if "v7" in kind else 1


def _pick_tile_d(d: int, t: int, in_itemsize: int) -> int:
    """Largest lane tile (multiple of 128, dividing d) that fits the VMEM budget.
    Prefers one lane tile per TensorCore; on 1-TC chips that means the full width
    (single grid step, fully contiguous HBM DMA)."""
    budget = 24 * 1024 * 1024                       # block footprint budget (bytes)
    per_col = 2 * t * (in_itemsize + 4)             # double-buffered in + f32 out
    cap_vmem = max(128, (budget // per_col) // 128 * 128)

    n_tc = _num_tensorcores()
    if n_tc > 1 and d % (128 * n_tc) == 0:
        target = d // n_tc                          # >=2 parallel steps on v7x
    else:
        target = d                                  # single full-width tile otherwise

    cap = min(target, cap_vmem)
    best = 128
    tile = 128
    while tile <= cap:
        if d % tile == 0:
            best = tile
        tile += 128
    return best


# ---------------------------------------------------------------------------- wrapper

def phase_shift_pallas(x2d: jax.Array, k_norm: jax.Array, donate_input: bool = False):
    """x2d: (T, D) input; k_norm: (1,) int32 in [0, T).
    Returns (T, D) float32 rolled by k_norm along axis 0."""
    T, D = x2d.shape

    if D % 128 == 0:
        tile_d = _pick_tile_d(D, T, jnp.dtype(x2d.dtype).itemsize)
    else:
        # Non-128-aligned feature width: span the full lane dim (no pad / no slice);
        # only the trailing sub-128 chunk uses a masked store.
        tile_d = D
    grid = (D // tile_d,)

    kernel = _phase_shift_roll_kernel if T % 8 == 0 else _phase_shift_onehot_kernel

    alias = {}
    if donate_input and x2d.dtype == jnp.float32:
        # Operand 0 is the scalar-prefetched shift; operand 1 is x2d.
        alias = {1: 0}

    return pl.pallas_call(
        kernel,
        out_shape=jax.ShapeDtypeStruct((T, D), jnp.float32),
        grid_spec=pltpu.PrefetchScalarGridSpec(
            num_scalar_prefetch=1,                  # k lands in SMEM
            grid=grid,                              # tile only the lane axis
            in_specs=[pl.BlockSpec((T, tile_d), lambda j, k_ref: (0, j))],
            out_specs=pl.BlockSpec((T, tile_d), lambda j, k_ref: (0, j)),
        ),
        input_output_aliases=alias,
        compiler_params=pltpu.CompilerParams(
            dimension_semantics=("parallel",),      # lane tiles are independent
            vmem_limit_bytes=32 * 1024 * 1024,      # safe on v5e/v6e/v7x
        ),
    )(k_norm, x2d)


def phase_shift(seq: jax.Array, key: jax.Array, max_shift: int = 2,
                donate_input: bool = False):
    """Equivalent of PhaseShift.forward: .float() cast + circular roll along dim 0 by a
    random k in [-max_shift, max_shift].  Returns (out, k_sampled)."""
    T = seq.shape[0]
    flat = seq.reshape(T, -1)                       # glue: flatten per-frame features

    if max_shift == 0:
        k = jnp.zeros((1,), jnp.int32)
    else:
        # glue: torch uses host-side random.randint; sample with jax.random instead.
        k = jax.random.randint(key, (1,), -max_shift, max_shift + 1, dtype=jnp.int32)
    k_norm = jnp.mod(k, T).astype(jnp.int32)        # normalize to [0, T): OOB-safe

    out_flat = phase_shift_pallas(flat, k_norm, donate_input=donate_input)
    return out_flat.reshape(seq.shape), k


# ---------------------------------------------------------------------------- test

if __name__ == "__main__":
    root = jax.random.PRNGKey(0)

    # (T frames, J joints, C channels, input dtype, donate-input-buffer)
    cases = [
        (8, 32, 4, jnp.float32, False),    # D=128 aligned, single tile, roll path
        (16, 25, 3, jnp.float32, False),   # D=75 non-aligned lanes, full-dim block
        (8, 512, 8, jnp.float32, True),    # D=4096, large contiguous tile(s), aliased
        (10, 25, 3, jnp.float32, False),   # T not multiple of 8 -> one-hot MXU path
        (8, 32, 4, jnp.bfloat16, False),   # sub-32-bit input: cast-then-roll in kernel
    ]
    for idx, (T, J, C, dt, donate) in enumerate(cases):
        k_data, k_shift = jax.random.split(jax.random.fold_in(root, idx))
        seq = jax.random.normal(k_data, (T, J, C), dtype=jnp.float32).astype(dt)
        seq_copy = jnp.copy(seq)           # keep a copy in case the input is donated

        out, k_used = phase_shift(seq, k_shift, max_shift=2, donate_input=donate)
        out = jax.block_until_ready(out)

        # Reference: jnp.roll has the same semantics as torch.roll along dim 0.
        ref = jnp.roll(seq_copy.astype(jnp.float32), int(k_used[0]), axis=0)
        assert out.shape == seq.shape and out.dtype == jnp.float32
        assert jnp.allclose(out, ref), (
            f"mismatch vs jnp.roll reference (case {idx}, k={int(k_used[0])})"
        )

    print("KERNEL_OK")
</pallas_src>

<mosaic_0001>
module attributes {stable_mosaic.version = 11 : i64} {
  func.func @_phase_shift_roll_kernel(%arg0: i32, %arg1: memref<1xi32, #tpu.memory_space<smem>>, %arg2: memref<8x128xf32, #tpu.memory_space<vmem>>, %arg3: memref<8x128xf32, #tpu.memory_space<vmem>>) attributes {dimension_semantics = [#tpu.dimension_semantics<parallel>], iteration_bounds = array<i64: 1>, scalar_prefetch = 1 : i64, scratch_operands = 0 : i64, tpu.core_type = #tpu.core_type<tc>, window_params = [{transform_indices = @transform_0, window_bounds = array<i64: 8, 128>}, {transform_indices = @transform_1, window_bounds = array<i64: 8, 128>}]} {
    %c0 = arith.constant 0 : index
    %0 = memref.load %arg1[%c0] : memref<1xi32, #tpu.memory_space<smem>>
    %c0_0 = arith.constant 0 : index
    %c0_1 = arith.constant 0 : index
    %1 = vector.load %arg2[%c0_0, %c0_1] : memref<8x128xf32, #tpu.memory_space<vmem>>, vector<8x128xf32>
    %2 = tpu.dynamic_rotate %1 by %0 dim 0 : vector<8x128xf32>, i32 -> vector<8x128xf32>
    %c0_2 = arith.constant 0 : index
    %c0_3 = arith.constant 0 : index
    %3 = vector.load %arg3[%c0_2, %c0_3] : memref<8x128xf32, #tpu.memory_space<vmem>>, vector<8x128xf32>
    tpu.vector_store %arg3[%c0_2, %c0_3], %2 {strides = array<i32>} : memref<8x128xf32, #tpu.memory_space<vmem>>, vector<8x128xf32>,
    return
  }
  func.func @transform_0(%arg0: i32, %arg1: memref<1xi32, #tpu.memory_space<smem>>) -> (i32, i32) {
    %c0_i32 = arith.constant 0 : i32
    %c0_i32_0 = arith.constant 0 : i32
    return %c0_i32, %arg0 : i32, i32
  }
  func.func @transform_1(%arg0: i32, %arg1: memref<1xi32, #tpu.memory_space<smem>>) -> (i32, i32) {
    %c0_i32 = arith.constant 0 : i32
    %c0_i32_0 = arith.constant 0 : i32
    return %c0_i32, %arg0 : i32, i32
  }
}

</mosaic_0001>

<bundles_post_ra>
// kernel: tpu_custom_call.1
= control target key start
LH: loop header
LB: loop body
LE: loop exit
PB: predicated region body
PF: predicated region fallthrough
CT: control target
= control target key end

     0   :  { %8 = vsyncpa [#allocation5], 0  ;;  %s140_s0 = inlined_call_operand.<no memory space> [shape: s32[1], index: 0, kind: input, shape index: {}]   ;;  %s141_s1 = inlined_call_operand.hbm [shape: f32[8,128], index: 1, kind: input, shape index: {}]   ;;  %s142_s2 = inlined_call_operand.hbm [shape: f32[8,128], index: 2, kind: output, shape index: {}]  }
   0x1   :  { %9 = vsyncpa [#allocation6], 0  ;;  %s96_s9 = smov [#allocation4]   ;;  %s48_s13 = scalar_lea.hbm %s141_s1, 128 }
   0x2   :  { %s16_s10 = sshll.u32 %s96_s9, 4  ;;  %p49_p0 = scmp.ne.s32.totalorder %s141_s1, %s48_s13  ;;  %s17_s10 = int_to_ptr.vmem [resolvable:$true] %s16_s10 }
   0x3   :  { %p52_p1 = scmp.lt.u32.totalorder %s48_s13, %s141_s1 }
   0x5   :  { %p54_p2 = pnand %p52_p1, %p49_p0 }
   0x7   :  { %57 = shalt.err (!%p54_p2)
}
   0x8   :  { %s58_s18 = scalar_lea.vmem %s17_s10, 128  ;;  %p63_p4 = scmp.lt.s32.totalorder %s17_s10, %s17_s10 }
   0x9   :  { %p59_p3 = scmp.ne.s32.totalorder %s17_s10, %s58_s18  ;;  %p64_p5 = scmp.lt.s32.totalorder %s58_s18, %s58_s18 }
   0xb   :  { %p65_p6 = por %p64_p5, %p63_p4 }
   0xd   :  { %p66_p7 = pnand %p65_p6, %p59_p3 }
   0xf   :  { %69 = shalt.err (!%p66_p7)
}
  0x10   :  { %19 = dma.hbm_to_vmem [thread:$0]  %s141_s1, 128, %s17_s10, [#allocation5]  }
  0x11   :  { %92 = dma.done.wait [#allocation5], 128  }
  0x12   :  { %93 = vsyncadd [#allocation5], 4294967168  ;;  %s25_s23 = sand.u32 7, %s140_s0   ;;  %s97_s25 = smov [#allocation7]   ;;  %v24_v1 = vld [vmem:[#allocation4] sm:$0xff] }
  0x13   :  { %s27_s24 = ssub.s32 8, %s25_s23  ;;  %s37_s26 = sshll.u32 %s97_s25, 4  ;;  %s38_s26 = int_to_ptr.vmem [resolvable:$true] %s37_s26 }
  0x14   :  { %v28_v0 = vstv %s27_s24  ;;  %s70_s27 = scalar_lea.vmem %s38_s26, 128  ;;  %p75_p9 = scmp.lt.s32.totalorder %s38_s26, %s38_s26 }
  0x15   :  { %v29_v2 = vrot.slane %v24_v1, %v28_v0  ;;  %p71_p8 = scmp.ne.s32.totalorder %s38_s26, %s70_s27  ;;  %p76_p10 = scmp.lt.s32.totalorder %s70_s27, %s70_s27 }
  0x17   :  { %30 = vst [vmem:[#allocation7] sm:$0xff] %v29_v2  ;;  %p77_p11 = por %p76_p10, %p75_p9 }
  0x19   :  { %p78_p12 = pnand %p77_p11, %p71_p8 }
  0x1b   :  { %81 = shalt.err (!%p78_p12)
}
  0x1c   :  { %s82_s29 = scalar_lea.hbm %s142_s2, 128 }
  0x1d   :  { %p83_p13 = scmp.ne.s32.totalorder %s142_s2, %s82_s29  ;;  %p86_p0 = scmp.lt.u32.totalorder %s82_s29, %s142_s2 }
  0x1f   :  { %p88_p1 = pnand %p86_p0, %p83_p13 }
  0x21   :  { %91 = shalt.err (!%p88_p1)
}
  0x22   :  { %40 = dma.vmem_to_hbm [thread:$0]  %s38_s26, 128, %s142_s2, [#allocation6]  }
  0x23   :  { %94 = dma.done.wait [#allocation6], 128  }
  0x24   :  { %95 = vsyncadd [#allocation6], 4294967168 }
  0x25   :  { %44 = vsyncpa [#allocation5], 1 }
  0x26   :  { %45 = vsyncpa [#allocation6], 1 }

</bundles_post_ra>
